<compile_context>
chip_gen: v7x
topology: tpu7x:2x2x1
jax: 0.10.0
libtpu: 0.0.40
codegen_flags: <defaults>
</compile_context>

<pallas_src>
import functools

import jax
import jax.numpy as jnp
import numpy as np
from jax import lax
from jax.experimental import pallas as pl
from jax.experimental.pallas import tpu as pltpu

ALPHA = 0.25
GAMMA = 2.0  # gamma == 2 -> implemented as an exact square inside the kernel

# Anchor-feature rows (precomputed once in the wrapper, lane-dense over A):
#   0:3  = [acx, acy, log(aw), log(ah)]   regression offsets
#   4:7  = [10/aw, 10/ah, 5, 5]           regression scales (== 1/(0.1*aw) ...)
#   8:11 = [ax1, ay1, ax2, ay2]           IoU corners
#   12   = aw * ah                        anchor area
#   13:15= zero padding (keeps sublane dim a multiple of 8)
_ANC_ROWS = 16
# Gather-feature rows (per annotation, M in lanes; matmul LHS):
#   0:3 = [bcx, bcy, log(max(bw,1)), log(max(bh,1))], 4 = label, 5:7 = padding
_GAT_ROWS = 8


def _focal_loss_kernel(cls_ref, reg_ref, anc_ref, ann_iou_ref, ann_gat_ref, out_ref):
    t = pl.program_id(1)

    # Output block (1, 3, 128) is resident across the anchor-tile axis:
    # row 0 = sum of focal cls loss, row 1 = sum of smooth-L1, row 2 = num_pos.
    @pl.when(t == 0)
    def _():
        out_ref[...] = jnp.zeros_like(out_ref)

    cls = jnp.clip(cls_ref[0], 1e-4, 1.0 - 1e-4)        # (C, TA)
    reg = reg_ref[0]                                     # (4, TA)
    anc = anc_ref[...]                                   # (16, TA)
    ann_iou = ann_iou_ref[0]                             # (M, 6)
    ann_gat = ann_gat_ref[0]                             # (8, M)

    C, TA = cls.shape
    M = ann_iou.shape[0]

    off = anc[0:4, :]                                    # [acx, acy, log aw, log ah]
    scale = anc[4:8, :]                                  # [10/aw, 10/ah, 5, 5]
    ax1 = anc[8:9, :]
    ay1 = anc[9:10, :]
    ax2 = anc[10:11, :]
    ay2 = anc[11:12, :]
    a_area = anc[12:13, :]                               # (1, TA)

    bx1 = ann_iou[:, 0:1]                                # (M, 1)
    by1 = ann_iou[:, 1:2]
    bx2 = ann_iou[:, 2:3]
    by2 = ann_iou[:, 3:4]
    b_area = ann_iou[:, 4:5]
    b_valid = ann_iou[:, 5:6]

    # ---- IoU between every annotation (sublanes) and every anchor (lanes) ----
    iw = jnp.maximum(jnp.minimum(ax2, bx2) - jnp.maximum(ax1, bx1), 0.0)
    ih = jnp.maximum(jnp.minimum(ay2, by2) - jnp.maximum(ay1, by1), 0.0)
    inter = iw * ih                                      # (M, TA)
    ua = jnp.maximum(a_area + b_area - inter, 1e-8)
    iou = inter / ua
    iou = jnp.where(b_valid > 0.0, iou, -1.0)            # padding can never be selected

    iou_max = jnp.max(iou, axis=0, keepdims=True)        # (1, TA)
    m_idx = lax.broadcasted_iota(jnp.int32, (M, TA), 0)
    # first annotation index achieving the max (matches the numpy/torch argmax)
    first_max = jnp.min(jnp.where(iou == iou_max, m_idx, M), axis=0, keepdims=True)
    oh = (m_idx == first_max).astype(jnp.float32)        # (M, TA) one-hot assignment

    # ---- annotation gather as a single MXU matmul: (8, M) @ (M, TA) ----
    gathered = jnp.dot(ann_gat, oh, preferred_element_type=jnp.float32,
                       precision=lax.Precision.HIGHEST)  # (8, TA)
    gt = gathered[0:4, :]                                # [bcx, bcy, log bw, log bh]
    ass_lab = gathered[4:5, :]                           # (1, TA) float label

    positive = iou_max >= 0.5                            # (1, TA)
    lt04 = iou_max < 0.4
    num_pos_tile = jnp.sum(positive.astype(jnp.float32))

    # ---- focal classification loss ----
    cls_iota = lax.broadcasted_iota(jnp.int32, (C, TA), 0)
    # labels are small non-negative ints; the matmul gather is exact, the
    # +0.5 truncation makes the compare robust anyway.
    lab_i = (ass_lab + 0.5).astype(jnp.int32)            # (1, TA)
    one_hot_cls = (cls_iota == lab_i).astype(jnp.float32)  # (C, TA)
    base = jnp.where(lt04, 0.0, -1.0)                    # (1, TA)
    targets = jnp.where(positive, one_hot_cls, base)     # (C, TA)

    is_one = targets == 1.0
    alpha_factor = jnp.where(is_one, ALPHA, 1.0 - ALPHA)
    focal_weight = jnp.where(is_one, 1.0 - cls, cls)
    focal_weight = alpha_factor * (focal_weight * focal_weight)   # gamma == 2
    bce = -jnp.log(jnp.where(is_one, cls, 1.0 - cls))    # one log instead of two
    cls_loss = jnp.where(targets != -1.0, focal_weight * bce, 0.0)
    cls_sum_tile = jnp.sum(cls_loss)

    # ---- smooth-L1 regression loss, one fused (4, TA) block ----
    tgt = (gt - off) * scale                             # (4, TA)
    diff = jnp.abs(tgt - reg)
    sl1 = jnp.where(diff <= 1.0 / 9.0, 4.5 * diff * diff, diff - 0.5 / 9.0)
    reg_sum_tile = jnp.sum(jnp.where(positive, sl1, 0.0))

    out_ref[0, 0:1, :] += cls_sum_tile
    out_ref[0, 1:2, :] += reg_sum_tile
    out_ref[0, 2:3, :] += num_pos_tile


@functools.partial(jax.jit, static_argnames=("anchor_tile",))
def focal_loss_pallas(classifications, regressions, anchors, annotations,
                      anchor_tile=2048):
    B, A, C = classifications.shape
    M = annotations.shape[1]
    f32 = jnp.float32

    # anchor tile: multiple of 128 that divides A, or fall back to the full dim
    TA = anchor_tile
    if TA is None or A <= TA or A % TA != 0 or TA % 128 != 0:
        TA = A
    T = A // TA

    # ---- lane-dense layouts + hoisted anchor/annotation constants ----
    cls_t = jnp.transpose(classifications, (0, 2, 1)).astype(f32)   # (B, C, A)
    reg_t = jnp.transpose(regressions, (0, 2, 1)).astype(f32)       # (B, 4, A)

    anc = anchors[0].astype(f32)                                    # (A, 4)
    ax1, ay1, ax2, ay2 = anc[:, 0], anc[:, 1], anc[:, 2], anc[:, 3]
    aw = ax2 - ax1
    ah = ay2 - ay1
    acx = ax1 + 0.5 * aw
    acy = ay1 + 0.5 * ah
    five = jnp.full_like(aw, 5.0)
    zero_a = jnp.zeros_like(aw)
    anc_feat = jnp.stack(
        [acx, acy, jnp.log(aw), jnp.log(ah),
         10.0 / aw, 10.0 / ah, five, five,
         ax1, ay1, ax2, ay2, aw * ah,
         zero_a, zero_a, zero_a], axis=0)                           # (16, A)

    ann = annotations.astype(f32)                                   # (B, M, 5)
    bx1, by1, bx2, by2, blab = (ann[..., 0], ann[..., 1], ann[..., 2],
                                ann[..., 3], ann[..., 4])
    b_area = (bx2 - bx1) * (by2 - by1)
    b_valid = (blab != -1.0).astype(f32)
    ann_iou = jnp.stack([bx1, by1, bx2, by2, b_area, b_valid], axis=-1)  # (B, M, 6)

    bw = bx2 - bx1
    bh = by2 - by1
    bcx = bx1 + 0.5 * bw
    bcy = by1 + 0.5 * bh
    log_bw = jnp.log(jnp.maximum(bw, 1.0))
    log_bh = jnp.log(jnp.maximum(bh, 1.0))
    zero_m = jnp.zeros_like(blab)
    ann_gat = jnp.stack([bcx, bcy, log_bw, log_bh, blab,
                         zero_m, zero_m, zero_m], axis=1)           # (B, 8, M)

    out = pl.pallas_call(
        _focal_loss_kernel,
        out_shape=jax.ShapeDtypeStruct((B, 3, 128), f32),
        grid_spec=pltpu.PrefetchScalarGridSpec(
            num_scalar_prefetch=0,
            grid=(B, T),
            in_specs=[
                pl.BlockSpec((1, C, TA), lambda b, t: (b, 0, t)),
                pl.BlockSpec((1, 4, TA), lambda b, t: (b, 0, t)),
                pl.BlockSpec((_ANC_ROWS, TA), lambda b, t: (0, t)),   # shared anchors
                pl.BlockSpec((1, M, 6), lambda b, t: (b, 0, 0)),      # resident across t
                pl.BlockSpec((1, _GAT_ROWS, M), lambda b, t: (b, 0, 0)),
            ],
            out_specs=pl.BlockSpec((1, 3, 128), lambda b, t: (b, 0, 0)),
        ),
        compiler_params=pltpu.CompilerParams(
            dimension_semantics=("parallel", "arbitrary")),
    )(cls_t, reg_t, anc_feat, ann_iou, ann_gat)

    cls_sum = out[:, 0, 0]
    reg_sum = out[:, 1, 0]
    npos = out[:, 2, 0]
    cls_losses = cls_sum / jnp.maximum(npos, 1.0)
    reg_losses = jnp.where(npos > 0.0,
                           reg_sum / jnp.maximum(4.0 * npos, 1.0),
                           0.0)
    return (jnp.mean(cls_losses, keepdims=True),
            jnp.mean(reg_losses, keepdims=True))


# ---- pure numpy reference mirroring the PyTorch forward exactly ----
def focal_loss_ref(classifications, regressions, anchors, annotations):
    alpha, _ = ALPHA, GAMMA
    B = classifications.shape[0]
    anchor = anchors[0]
    aw = anchor[:, 2] - anchor[:, 0]
    ah = anchor[:, 3] - anchor[:, 1]
    acx = anchor[:, 0] + 0.5 * aw
    acy = anchor[:, 1] + 0.5 * ah
    cls_losses, reg_losses = [], []
    for j in range(B):
        c = np.clip(classifications[j], 1e-4, 1.0 - 1e-4)
        r = regressions[j]
        bbox = annotations[j]
        bbox = bbox[bbox[:, 4] != -1]
        if bbox.shape[0] == 0:
            cls_losses.append(np.sum((1.0 - alpha) * (c * c) * (-np.log(1.0 - c))))
            reg_losses.append(np.float32(0.0))
            continue
        area = (bbox[:, 2] - bbox[:, 0]) * (bbox[:, 3] - bbox[:, 1])
        iw = np.minimum(anchor[:, 2:3], bbox[None, :, 2]) - np.maximum(anchor[:, 0:1], bbox[None, :, 0])
        ih = np.minimum(anchor[:, 3:4], bbox[None, :, 3]) - np.maximum(anchor[:, 1:2], bbox[None, :, 1])
        iw = np.clip(iw, 0, None)
        ih = np.clip(ih, 0, None)
        ua = np.clip((aw * ah)[:, None] + area[None, :] - iw * ih, 1e-8, None)
        iou = iw * ih / ua
        iou_max = iou.max(axis=1)
        iou_argmax = iou.argmax(axis=1)
        targets = -np.ones_like(c)
        targets[iou_max < 0.4, :] = 0
        positive = iou_max >= 0.5
        num_pos = positive.sum()
        assigned = bbox[iou_argmax]
        targets[positive, :] = 0
        targets[positive, assigned[positive, 4].astype(np.int64)] = 1
        alpha_factor = np.where(targets == 1.0, alpha, 1.0 - alpha)
        focal_weight = np.where(targets == 1.0, 1.0 - c, c)
        focal_weight = alpha_factor * (focal_weight * focal_weight)
        bce = -(targets * np.log(c) + (1.0 - targets) * np.log(1.0 - c))
        cls_loss = np.where(targets != -1.0, focal_weight * bce, 0.0)
        cls_losses.append(cls_loss.sum() / max(float(num_pos), 1.0))
        if num_pos > 0:
            apos = assigned[positive]
            awp, ahp = aw[positive], ah[positive]
            acxp, acyp = acx[positive], acy[positive]
            gw = apos[:, 2] - apos[:, 0]
            gh = apos[:, 3] - apos[:, 1]
            gcx = apos[:, 0] + 0.5 * gw
            gcy = apos[:, 1] + 0.5 * gh
            gw = np.clip(gw, 1, None)
            gh = np.clip(gh, 1, None)
            t = np.stack([(gcx - acxp) / awp, (gcy - acyp) / ahp,
                          np.log(gw / awp), np.log(gh / ahp)], axis=1)
            t = t / np.array([[0.1, 0.1, 0.2, 0.2]], np.float32)
            diff = np.abs(t - r[positive])
            rl = np.where(diff <= 1.0 / 9.0, 0.5 * 9.0 * diff * diff, diff - 0.5 / 9.0)
            reg_losses.append(rl.mean())
        else:
            reg_losses.append(np.float32(0.0))
    return (np.mean(np.stack(cls_losses), keepdims=True),
            np.mean(np.stack(reg_losses), keepdims=True))


if __name__ == "__main__":
    B, A, C, M = 2, 128, 8, 8
    key = jax.random.PRNGKey(0)
    k1, k2, k3, k4, k5, k6 = jax.random.split(key, 6)

    # deterministic synthetic anchors (positive widths/heights)
    ax1 = jax.random.uniform(k1, (A,), minval=0.0, maxval=50.0)
    ay1 = jax.random.uniform(k2, (A,), minval=0.0, maxval=50.0)
    aw_ = jax.random.uniform(k3, (A,), minval=5.0, maxval=25.0)
    ah_ = jax.random.uniform(k4, (A,), minval=5.0, maxval=25.0)
    anchors = jnp.stack([ax1, ay1, ax1 + aw_, ay1 + ah_], axis=1)[None].astype(jnp.float32)

    classifications = jax.nn.sigmoid(jax.random.normal(k5, (B, A, C))).astype(jnp.float32)
    regressions = (0.1 * jax.random.normal(k6, (B, A, 4))).astype(jnp.float32)

    # annotations: image 0 has 3 valid boxes (two equal to anchor boxes -> guaranteed
    # positives), image 1 has no valid boxes (exercises the empty-annotation path).
    ann = np.full((B, M, 5), -1.0, dtype=np.float32)
    ann[:, :, :4] = 0.0
    anchors_np = np.asarray(anchors)
    ann[0, 0, :4] = anchors_np[0, 3, :4];  ann[0, 0, 4] = 2.0
    ann[0, 1, :4] = anchors_np[0, 50, :4]; ann[0, 1, 4] = 5.0
    ann[0, 2, :4] = np.array([10.0, 10.0, 30.0, 28.0], np.float32); ann[0, 2, 4] = 1.0
    annotations = jnp.asarray(ann)

    cls_l, reg_l = focal_loss_pallas(classifications, regressions, anchors, annotations)
    jax.block_until_ready((cls_l, reg_l))

    ref_cls, ref_reg = focal_loss_ref(np.asarray(classifications), np.asarray(regressions),
                                      np.asarray(anchors), np.asarray(annotations))
    assert np.allclose(np.asarray(cls_l), ref_cls, rtol=2e-3, atol=1e-4), (cls_l, ref_cls)
    assert np.allclose(np.asarray(reg_l), ref_reg, rtol=2e-3, atol=1e-4), (reg_l, ref_reg)
    print("KERNEL_OK")
</pallas_src>

<mosaic_0001>
module attributes {stable_mosaic.version = 11 : i64} {
  func.func @_focal_loss_kernel(%arg0: i32, %arg1: i32, %arg2: memref<1x8x128xf32, #tpu.memory_space<vmem>>, %arg3: memref<1x4x128xf32, #tpu.memory_space<vmem>>, %arg4: memref<16x128xf32, #tpu.memory_space<vmem>>, %arg5: memref<1x8x6xf32, #tpu.memory_space<vmem>>, %arg6: memref<1x8x8xf32, #tpu.memory_space<vmem>>, %arg7: memref<1x3x128xf32, #tpu.memory_space<vmem>>) attributes {dimension_semantics = [#tpu.dimension_semantics<parallel>, #tpu.dimension_semantics<arbitrary>], iteration_bounds = array<i64: 2, 1>, scalar_prefetch = 0 : i64, scratch_operands = 0 : i64, tpu.core_type = #tpu.core_type<tc>, window_params = [{transform_indices = @transform_0, window_bounds = array<i64: 1, 8, 128>}, {transform_indices = @transform_1, window_bounds = array<i64: 1, 4, 128>}, {transform_indices = @transform_2, window_bounds = array<i64: 16, 128>}, {transform_indices = @transform_3, window_bounds = array<i64: 1, 8, 6>}, {transform_indices = @transform_4, window_bounds = array<i64: 1, 8, 8>}, {transform_indices = @transform_5, window_bounds = array<i64: 1, 3, 128>}]} {
    %c0_i32 = arith.constant 0 : i32
    %0 = arith.cmpi eq, %arg1, %c0_i32 : i32
    %1 = arith.extui %0 : i1 to i32
    %c0_i32_0 = arith.constant 0 : i32
    %2 = arith.cmpi ne, %1, %c0_i32_0 : i32
    scf.if %2 {
      %cst_59 = arith.constant 0.000000e+00 : f32
      %169 = vector.broadcast %cst_59 : f32 to vector<1x3x128xf32>
      %c0_60 = arith.constant 0 : index
      %c0_61 = arith.constant 0 : index
      %c0_62 = arith.constant 0 : index
      %170 = vector.load %arg7[%c0_60, %c0_61, %c0_62] : memref<1x3x128xf32, #tpu.memory_space<vmem>>, vector<1x3x128xf32>
      tpu.vector_store %arg7[%c0_60, %c0_61, %c0_62], %169 {strides = array<i32>} : memref<1x3x128xf32, #tpu.memory_space<vmem>>, vector<1x3x128xf32>,
    } else {
    }
    %c0 = arith.constant 0 : index
    %c0_1 = arith.constant 0 : index
    %c0_2 = arith.constant 0 : index
    %3 = vector.load %arg2[%c0, %c0_1, %c0_2] : memref<1x8x128xf32, #tpu.memory_space<vmem>>, vector<1x8x128xf32>
    %4 = vector.shape_cast %3 : vector<1x8x128xf32> to vector<8x128xf32>
    %cst = arith.constant 9.99999974E-5 : f32
    %cst_3 = arith.constant 0.999899983 : f32
    %5 = vector.broadcast %cst : f32 to vector<8x128xf32>
    %6 = arith.maximumf %5, %4 : vector<8x128xf32>
    %7 = vector.broadcast %cst_3 : f32 to vector<8x128xf32>
    %8 = arith.minimumf %7, %6 : vector<8x128xf32>
    %c0_4 = arith.constant 0 : index
    %c0_5 = arith.constant 0 : index
    %c0_6 = arith.constant 0 : index
    %9 = vector.load %arg3[%c0_4, %c0_5, %c0_6] : memref<1x4x128xf32, #tpu.memory_space<vmem>>, vector<1x4x128xf32>
    %10 = vector.shape_cast %9 : vector<1x4x128xf32> to vector<4x128xf32>
    %c0_7 = arith.constant 0 : index
    %c0_8 = arith.constant 0 : index
    %11 = vector.load %arg4[%c0_7, %c0_8] : memref<16x128xf32, #tpu.memory_space<vmem>>, vector<16x128xf32>
    %c0_9 = arith.constant 0 : index
    %c0_10 = arith.constant 0 : index
    %c0_11 = arith.constant 0 : index
    %12 = vector.load %arg5[%c0_9, %c0_10, %c0_11] : memref<1x8x6xf32, #tpu.memory_space<vmem>>, vector<1x8x6xf32>
    %13 = vector.shape_cast %12 : vector<1x8x6xf32> to vector<8x6xf32>
    %c0_12 = arith.constant 0 : index
    %c0_13 = arith.constant 0 : index
    %c0_14 = arith.constant 0 : index
    %14 = vector.load %arg6[%c0_12, %c0_13, %c0_14] : memref<1x8x8xf32, #tpu.memory_space<vmem>>, vector<1x8x8xf32>
    %15 = vector.shape_cast %14 : vector<1x8x8xf32> to vector<8x8xf32>
    %16 = vector.extract_strided_slice %11 {offsets = [0, 0], sizes = [4, 128], strides = [1, 1]} : vector<16x128xf32> to vector<4x128xf32>
    %17 = vector.extract_strided_slice %11 {offsets = [4, 0], sizes = [4, 128], strides = [1, 1]} : vector<16x128xf32> to vector<4x128xf32>
    %18 = vector.extract_strided_slice %11 {offsets = [8, 0], sizes = [1, 128], strides = [1, 1]} : vector<16x128xf32> to vector<1x128xf32>
    %19 = vector.extract_strided_slice %11 {offsets = [9, 0], sizes = [1, 128], strides = [1, 1]} : vector<16x128xf32> to vector<1x128xf32>
    %20 = vector.extract_strided_slice %11 {offsets = [10, 0], sizes = [1, 128], strides = [1, 1]} : vector<16x128xf32> to vector<1x128xf32>
    %21 = vector.extract_strided_slice %11 {offsets = [11, 0], sizes = [1, 128], strides = [1, 1]} : vector<16x128xf32> to vector<1x128xf32>
    %22 = vector.extract_strided_slice %11 {offsets = [12, 0], sizes = [1, 128], strides = [1, 1]} : vector<16x128xf32> to vector<1x128xf32>
    %23 = vector.extract_strided_slice %13 {offsets = [0, 0], sizes = [8, 1], strides = [1, 1]} : vector<8x6xf32> to vector<8x1xf32>
    %24 = vector.extract_strided_slice %13 {offsets = [0, 1], sizes = [8, 1], strides = [1, 1]} : vector<8x6xf32> to vector<8x1xf32>
    %25 = vector.extract_strided_slice %13 {offsets = [0, 2], sizes = [8, 1], strides = [1, 1]} : vector<8x6xf32> to vector<8x1xf32>
    %26 = vector.extract_strided_slice %13 {offsets = [0, 3], sizes = [8, 1], strides = [1, 1]} : vector<8x6xf32> to vector<8x1xf32>
    %27 = vector.extract_strided_slice %13 {offsets = [0, 4], sizes = [8, 1], strides = [1, 1]} : vector<8x6xf32> to vector<8x1xf32>
    %28 = vector.extract_strided_slice %13 {offsets = [0, 5], sizes = [8, 1], strides = [1, 1]} : vector<8x6xf32> to vector<8x1xf32>
    %29 = vector.broadcast %20 : vector<1x128xf32> to vector<8x128xf32>
    %30 = vector.broadcast %25 : vector<8x1xf32> to vector<8x128xf32>
    %31 = arith.minimumf %29, %30 : vector<8x128xf32>
    %32 = vector.broadcast %18 : vector<1x128xf32> to vector<8x128xf32>
    %33 = vector.broadcast %23 : vector<8x1xf32> to vector<8x128xf32>
    %34 = arith.maximumf %32, %33 : vector<8x128xf32>
    %35 = arith.subf %31, %34 : vector<8x128xf32>
    %cst_15 = arith.constant 0.000000e+00 : f32
    %36 = vector.broadcast %cst_15 : f32 to vector<8x128xf32>
    %37 = arith.maximumf %35, %36 : vector<8x128xf32>
    %38 = vector.broadcast %21 : vector<1x128xf32> to vector<8x128xf32>
    %39 = vector.broadcast %26 : vector<8x1xf32> to vector<8x128xf32>
    %40 = arith.minimumf %38, %39 : vector<8x128xf32>
    %41 = vector.broadcast %19 : vector<1x128xf32> to vector<8x128xf32>
    %42 = vector.broadcast %24 : vector<8x1xf32> to vector<8x128xf32>
    %43 = arith.maximumf %41, %42 : vector<8x128xf32>
    %44 = arith.subf %40, %43 : vector<8x128xf32>
    %cst_16 = arith.constant 0.000000e+00 : f32
    %45 = vector.broadcast %cst_16 : f32 to vector<8x128xf32>
    %46 = arith.maximumf %44, %45 : vector<8x128xf32>
    %47 = arith.mulf %37, %46 : vector<8x128xf32>
    %48 = vector.broadcast %22 : vector<1x128xf32> to vector<8x128xf32>
    %49 = vector.broadcast %27 : vector<8x1xf32> to vector<8x128xf32>
    %50 = arith.addf %48, %49 : vector<8x128xf32>
    %51 = arith.subf %50, %47 : vector<8x128xf32>
    %cst_17 = arith.constant 9.99999993E-9 : f32
    %52 = vector.broadcast %cst_17 : f32 to vector<8x128xf32>
    %53 = arith.maximumf %51, %52 : vector<8x128xf32>
    %54 = arith.divf %47, %53 : vector<8x128xf32>
    %cst_18 = arith.constant 0.000000e+00 : f32
    %55 = vector.broadcast %cst_18 : f32 to vector<8x1xf32>
    %56 = arith.cmpf ogt, %28, %55 : vector<8x1xf32>
    %cst_19 = arith.constant -1.000000e+00 : f32
    %57 = vector.shape_cast %56 : vector<8x1xi1> to vector<8x1xi1>
    %58 = vector.broadcast %57 : vector<8x1xi1> to vector<8x128xi1>
    %59 = vector.broadcast %cst_19 : f32 to vector<8x128xf32>
    %60 = arith.select %58, %54, %59 : vector<8x128xi1>, vector<8x128xf32>
    %cst_20 = arith.constant dense<0xFF800000> : vector<128xf32>
    %61 = vector.multi_reduction <maximumf>, %60, %cst_20 [0] : vector<8x128xf32> to vector<128xf32>
    %62 = vector.shape_cast %61 : vector<128xf32> to vector<1x128xf32>
    %63 = tpu.iota {dimensions = array<i32: 0>} : vector<8x128xi32>
    %64 = vector.broadcast %62 : vector<1x128xf32> to vector<8x128xf32>
    %65 = arith.cmpf oeq, %60, %64 : vector<8x128xf32>
    %c8_i32 = arith.constant 8 : i32
    %66 = vector.broadcast %c8_i32 : i32 to vector<8x128xi32>
    %67 = arith.select %65, %63, %66 : vector<8x128xi1>, vector<8x128xi32>
    %cst_21 = arith.constant dense<2147483647> : vector<128xi32>
    %68 = vector.multi_reduction <minsi>, %67, %cst_21 [0] : vector<8x128xi32> to vector<128xi32>
    %69 = vector.shape_cast %68 : vector<128xi32> to vector<1x128xi32>
    %70 = vector.broadcast %69 : vector<1x128xi32> to vector<8x128xi32>
    %71 = arith.cmpi eq, %63, %70 : vector<8x128xi32>
    %72 = arith.extui %71 : vector<8x128xi1> to vector<8x128xi32>
    %73 = arith.sitofp %72 : vector<8x128xi32> to vector<8x128xf32>
    %cst_22 = arith.constant dense<0.000000e+00> : vector<8x128xf32>
    %74 = tpu.matmul %15, %73, %cst_22 {dimension_numbers = #tpu.dot_dimension_numbers<[1], [0], [0], [1], [0, 0, 1, 1], [], []>, precision = #tpu.contract_precision<fp32>} : vector<8x8xf32>, vector<8x128xf32>, vector<8x128xf32> -> vector<8x128xf32>
    %75 = vector.extract_strided_slice %74 {offsets = [0, 0], sizes = [4, 128], strides = [1, 1]} : vector<8x128xf32> to vector<4x128xf32>
    %76 = vector.extract_strided_slice %74 {offsets = [4, 0], sizes = [1, 128], strides = [1, 1]} : vector<8x128xf32> to vector<1x128xf32>
    %cst_23 = arith.constant 5.000000e-01 : f32
    %77 = vector.broadcast %cst_23 : f32 to vector<1x128xf32>
    %78 = arith.cmpf oge, %62, %77 : vector<1x128xf32>
    %cst_24 = arith.constant 4.000000e-01 : f32
    %79 = vector.broadcast %cst_24 : f32 to vector<1x128xf32>
    %80 = arith.cmpf olt, %62, %79 : vector<1x128xf32>
    %81 = arith.extui %78 : vector<1x128xi1> to vector<1x128xi32>
    %82 = arith.sitofp %81 : vector<1x128xi32> to vector<1x128xf32>
    %83 = vector.shape_cast %82 : vector<1x128xf32> to vector<1x1x128xf32>
    %cst_25 = arith.constant dense<0.000000e+00> : vector<1xf32>
    %84 = vector.multi_reduction <add>, %83, %cst_25 [1, 2] : vector<1x1x128xf32> to vector<1xf32>
    %85 = vector.shape_cast %84 : vector<1xf32> to vector<1x1x1xf32>
    %86 = vector.extract %85[0, 0, 0] : f32 from vector<1x1x1xf32>
    %87 = tpu.iota {dimensions = array<i32: 0>} : vector<8x128xi32>
    %cst_26 = arith.constant 5.000000e-01 : f32
    %88 = vector.broadcast %cst_26 : f32 to vector<1x128xf32>
    %89 = arith.addf %76, %88 : vector<1x128xf32>
    %90 = arith.fptosi %89 : vector<1x128xf32> to vector<1x128xi32>
    %91 = vector.broadcast %90 : vector<1x128xi32> to vector<8x128xi32>
    %92 = arith.cmpi eq, %87, %91 : vector<8x128xi32>
    %93 = arith.extui %92 : vector<8x128xi1> to vector<8x128xi32>
    %94 = arith.sitofp %93 : vector<8x128xi32> to vector<8x128xf32>
    %cst_27 = arith.constant 0.000000e+00 : f32
    %cst_28 = arith.constant -1.000000e+00 : f32
    %95 = vector.broadcast %cst_27 : f32 to vector<1x128xf32>
    %96 = vector.broadcast %cst_28 : f32 to vector<1x128xf32>
    %97 = arith.select %80, %95, %96 : vector<1x128xi1>, vector<1x128xf32>
    %98 = vector.shape_cast %78 : vector<1x128xi1> to vector<1x128xi1>
    %99 = vector.broadcast %98 : vector<1x128xi1> to vector<8x128xi1>
    %100 = vector.shape_cast %97 : vector<1x128xf32> to vector<1x128xf32>
    %101 = vector.broadcast %100 : vector<1x128xf32> to vector<8x128xf32>
    %102 = arith.select %99, %94, %101 : vector<8x128xi1>, vector<8x128xf32>
    %cst_29 = arith.constant 1.000000e+00 : f32
    %103 = vector.broadcast %cst_29 : f32 to vector<8x128xf32>
    %104 = arith.cmpf oeq, %102, %103 : vector<8x128xf32>
    %cst_30 = arith.constant 2.500000e-01 : f32
    %cst_31 = arith.constant 7.500000e-01 : f32
    %105 = vector.broadcast %cst_30 : f32 to vector<8x128xf32>
    %106 = vector.broadcast %cst_31 : f32 to vector<8x128xf32>
    %107 = arith.select %104, %105, %106 : vector<8x128xi1>, vector<8x128xf32>
    %cst_32 = arith.constant 1.000000e+00 : f32
    %108 = vector.broadcast %cst_32 : f32 to vector<8x128xf32>
    %109 = arith.subf %108, %8 : vector<8x128xf32>
    %110 = arith.select %104, %109, %8 : vector<8x128xi1>, vector<8x128xf32>
    %111 = arith.mulf %110, %110 : vector<8x128xf32>
    %112 = arith.mulf %107, %111 : vector<8x128xf32>
    %cst_33 = arith.constant 1.000000e+00 : f32
    %113 = vector.broadcast %cst_33 : f32 to vector<8x128xf32>
    %114 = arith.subf %113, %8 : vector<8x128xf32>
    %115 = arith.select %104, %8, %114 : vector<8x128xi1>, vector<8x128xf32>
    %116 = math.log %115 : vector<8x128xf32>
    %cst_34 = arith.constant 0.000000e+00 : f32
    %117 = vector.broadcast %cst_34 : f32 to vector<8x128xf32>
    %118 = arith.subf %117, %116 : vector<8x128xf32>
    %cst_35 = arith.constant -1.000000e+00 : f32
    %119 = vector.broadcast %cst_35 : f32 to vector<8x128xf32>
    %120 = arith.cmpf one, %102, %119 : vector<8x128xf32>
    %121 = arith.mulf %112, %118 : vector<8x128xf32>
    %cst_36 = arith.constant 0.000000e+00 : f32
    %122 = vector.broadcast %cst_36 : f32 to vector<8x128xf32>
    %123 = arith.select %120, %121, %122 : vector<8x128xi1>, vector<8x128xf32>
    %124 = vector.shape_cast %123 : vector<8x128xf32> to vector<1x8x128xf32>
    %cst_37 = arith.constant dense<0.000000e+00> : vector<1xf32>
    %125 = vector.multi_reduction <add>, %124, %cst_37 [1, 2] : vector<1x8x128xf32> to vector<1xf32>
    %126 = vector.shape_cast %125 : vector<1xf32> to vector<1x1x1xf32>
    %127 = vector.extract %126[0, 0, 0] : f32 from vector<1x1x1xf32>
    %128 = arith.subf %75, %16 : vector<4x128xf32>
    %129 = arith.mulf %128, %17 : vector<4x128xf32>
    %130 = arith.subf %129, %10 : vector<4x128xf32>
    %131 = math.absf %130 : vector<4x128xf32>
    %cst_38 = arith.constant 0.111111112 : f32
    %132 = vector.broadcast %cst_38 : f32 to vector<4x128xf32>
    %133 = arith.cmpf ole, %131, %132 : vector<4x128xf32>
    %cst_39 = arith.constant 4.500000e+00 : f32
    %134 = vector.broadcast %cst_39 : f32 to vector<4x128xf32>
    %135 = arith.mulf %134, %131 : vector<4x128xf32>
    %136 = arith.mulf %135, %131 : vector<4x128xf32>
    %cst_40 = arith.constant 0.055555556 : f32
    %137 = vector.broadcast %cst_40 : f32 to vector<4x128xf32>
    %138 = arith.subf %131, %137 : vector<4x128xf32>
    %139 = arith.select %133, %136, %138 : vector<4x128xi1>, vector<4x128xf32>
    %cst_41 = arith.constant 0.000000e+00 : f32
    %140 = vector.shape_cast %78 : vector<1x128xi1> to vector<1x128xi1>
    %141 = vector.broadcast %140 : vector<1x128xi1> to vector<4x128xi1>
    %142 = vector.broadcast %cst_41 : f32 to vector<4x128xf32>
    %143 = arith.select %141, %139, %142 : vector<4x128xi1>, vector<4x128xf32>
    %144 = vector.shape_cast %143 : vector<4x128xf32> to vector<1x4x128xf32>
    %cst_42 = arith.constant dense<0.000000e+00> : vector<1xf32>
    %145 = vector.multi_reduction <add>, %144, %cst_42 [1, 2] : vector<1x4x128xf32> to vector<1xf32>
    %146 = vector.shape_cast %145 : vector<1xf32> to vector<1x1x1xf32>
    %147 = vector.extract %146[0, 0, 0] : f32 from vector<1x1x1xf32>
    %c0_43 = arith.constant 0 : index
    %c0_44 = arith.constant 0 : index
    %c0_45 = arith.constant 0 : index
    %148 = vector.load %arg7[%c0_43, %c0_44, %c0_45] : memref<1x3x128xf32, #tpu.memory_space<vmem>>, vector<1x1x128xf32>
    %149 = vector.shape_cast %148 : vector<1x1x128xf32> to vector<1x128xf32>
    %150 = vector.broadcast %127 : f32 to vector<1x128xf32>
    %151 = arith.addf %149, %150 : vector<1x128xf32>
    %c0_46 = arith.constant 0 : index
    %c0_47 = arith.constant 0 : index
    %c0_48 = arith.constant 0 : index
    %152 = vector.load %arg7[%c0_46, %c0_47, %c0_48] : memref<1x3x128xf32, #tpu.memory_space<vmem>>, vector<1x1x128xf32>
    %153 = vector.shape_cast %152 : vector<1x1x128xf32> to vector<1x128xf32>
    %154 = vector.shape_cast %151 : vector<1x128xf32> to vector<1x1x128xf32>
    tpu.vector_store %arg7[%c0_46, %c0_47, %c0_48], %154 {strides = array<i32>} : memref<1x3x128xf32, #tpu.memory_space<vmem>>, vector<1x1x128xf32>,
    %c0_49 = arith.constant 0 : index
    %c1 = arith.constant 1 : index
    %c0_50 = arith.constant 0 : index
    %155 = vector.load %arg7[%c0_49, %c1, %c0_50] : memref<1x3x128xf32, #tpu.memory_space<vmem>>, vector<1x1x128xf32>
    %156 = vector.shape_cast %155 : vector<1x1x128xf32> to vector<1x128xf32>
    %157 = vector.broadcast %147 : f32 to vector<1x128xf32>
    %158 = arith.addf %156, %157 : vector<1x128xf32>
    %c0_51 = arith.constant 0 : index
    %c1_52 = arith.constant 1 : index
    %c0_53 = arith.constant 0 : index
    %159 = vector.load %arg7[%c0_51, %c1_52, %c0_53] : memref<1x3x128xf32, #tpu.memory_space<vmem>>, vector<1x1x128xf32>
    %160 = vector.shape_cast %159 : vector<1x1x128xf32> to vector<1x128xf32>
    %161 = vector.shape_cast %158 : vector<1x128xf32> to vector<1x1x128xf32>
    tpu.vector_store %arg7[%c0_51, %c1_52, %c0_53], %161 {strides = array<i32>} : memref<1x3x128xf32, #tpu.memory_space<vmem>>, vector<1x1x128xf32>,
    %c0_54 = arith.constant 0 : index
    %c2 = arith.constant 2 : index
    %c0_55 = arith.constant 0 : index
    %162 = vector.load %arg7[%c0_54, %c2, %c0_55] : memref<1x3x128xf32, #tpu.memory_space<vmem>>, vector<1x1x128xf32>
    %163 = vector.shape_cast %162 : vector<1x1x128xf32> to vector<1x128xf32>
    %164 = vector.broadcast %86 : f32 to vector<1x128xf32>
    %165 = arith.addf %163, %164 : vector<1x128xf32>
    %c0_56 = arith.constant 0 : index
    %c2_57 = arith.constant 2 : index
    %c0_58 = arith.constant 0 : index
    %166 = vector.load %arg7[%c0_56, %c2_57, %c0_58] : memref<1x3x128xf32, #tpu.memory_space<vmem>>, vector<1x1x128xf32>
    %167 = vector.shape_cast %166 : vector<1x1x128xf32> to vector<1x128xf32>
    %168 = vector.shape_cast %165 : vector<1x128xf32> to vector<1x1x128xf32>
    tpu.vector_store %arg7[%c0_56, %c2_57, %c0_58], %168 {strides = array<i32>} : memref<1x3x128xf32, #tpu.memory_space<vmem>>, vector<1x1x128xf32>,
    return
  }
  func.func @transform_0(%arg0: i32, %arg1: i32) -> (i32, i32, i32) {
    %c0_i32 = arith.constant 0 : i32
    %c0_i32_0 = arith.constant 0 : i32
    return %arg0, %c0_i32, %arg1 : i32, i32, i32
  }
  func.func @transform_1(%arg0: i32, %arg1: i32) -> (i32, i32, i32) {
    %c0_i32 = arith.constant 0 : i32
    %c0_i32_0 = arith.constant 0 : i32
    return %arg0, %c0_i32, %arg1 : i32, i32, i32
  }
  func.func @transform_2(%arg0: i32, %arg1: i32) -> (i32, i32) {
    %c0_i32 = arith.constant 0 : i32
    %c0_i32_0 = arith.constant 0 : i32
    return %c0_i32, %arg1 : i32, i32
  }
  func.func @transform_3(%arg0: i32, %arg1: i32) -> (i32, i32, i32) {
    %c0_i32 = arith.constant 0 : i32
    %c0_i32_0 = arith.constant 0 : i32
    %c0_i32_1 = arith.constant 0 : i32
    return %arg0, %c0_i32, %c0_i32_0 : i32, i32, i32
  }
  func.func @transform_4(%arg0: i32, %arg1: i32) -> (i32, i32, i32) {
    %c0_i32 = arith.constant 0 : i32
    %c0_i32_0 = arith.constant 0 : i32
    %c0_i32_1 = arith.constant 0 : i32
    return %arg0, %c0_i32, %c0_i32_0 : i32, i32, i32
  }
  func.func @transform_5(%arg0: i32, %arg1: i32) -> (i32, i32, i32) {
    %c0_i32 = arith.constant 0 : i32
    %c0_i32_0 = arith.constant 0 : i32
    %c0_i32_1 = arith.constant 0 : i32
    return %arg0, %c0_i32, %c0_i32_0 : i32, i32, i32
  }
}

</mosaic_0001>

<bundles_post_ra>
// kernel: focal_loss_pallas.1
= control target key start
LH: loop header
LB: loop body
LE: loop exit
PB: predicated region body
PF: predicated region fallthrough
CT: control target
= control target key end

     0   :  { %s1262_s18 = smov 0   ;;  %s1264_s19 = smov 0   ;;  %s1383_s0 = inlined_call_operand.vmem [shape: f32[2,8,128], index: 0, kind: input, shape index: {}]   ;;  %s1384_s1 = inlined_call_operand.vmem [shape: f32[2,4,128], index: 1, kind: input, shape index: {}]   ;;  %s1385_s2 = inlined_call_operand.vmem [shape: f32[16,128], index: 2, kind: input, shape index: {}]   ;;  %s1386_s3 = inlined_call_operand.vmem [shape: f32[2,8,6], index: 3, kind: input, shape index: {}]   ;;  %s1387_s4 = inlined_call_operand.vmem [shape: f32[2,8,8], index: 4, kind: input, shape index: {}]   ;;  %s1388_s5 = inlined_call_operand.vmem [shape: f32[2,3,128], index: 5, kind: output, shape index: {}]  }
   0x1   :  { %s1266_s20 = smov 0  }
   0x2 LB: > { %s27_s21 = sadd.s32 1, %s1215_s19  ;;  %p1078_p0 = scmp.ge.s32.totalorder %s1219_s20, 1  ;;  %s1219_s20 = sphi %s1266_s20, %s15_s20   ;;  %s1215_s19 = sphi %s1264_s19, %s1390_s19   ;;  %s1211_s18 = sphi %s1262_s18, %s1389_s18  }
   0x3   : > { %p29_p1 = scmp.ge.s32.totalorder %s27_s21, 2  ;;  %p244_p2 = scmp.lt.s32.totalorder %s1219_s20, 3 }
   0x5   : > { %s1392_s21 = smov (%p29_p1, %s27_s21), 0  ;;  %p245_p3 = pnand %p1078_p0, %p244_p2 }
   0x6   : > { %p292_p4 = scmp.lt.s32.totalorder (!%p245_p3), %s1211_s18, 1  ;;  %v1221_v0 = vmov (!%p245_p3), 3   ;;  %v1222_v1 = vmov (!%p245_p3), 2   ;;  %v1223_v3 = vmov (!%p245_p3), 1   ;;  %v1224_v4 = vmov (!%p245_p3), 0   ;;  %v332_v15 = vld [vmem:[%s1385_s2 + $0x8] sm:$0xff] (!%p245_p3) }
   0x7   : > { %248 = sbr.rel (%p245_p3) target bundleno = 676 (0x2a4), region = 40  ;;  %1189 = vset.pattern.permute.xlu1 (!%p245_p3), %v1221_v0  ;;  %1187 = vset.pattern.permute.xlu0 (!%p245_p3), %v1222_v1  ;;  %v1225_v6 = vmov (!%p245_p3), 4   ;;  %v1226_v7 = vmov (!%p245_p3), 5   ;;  %v1227_v8 = vmov (!%p245_p3), 0.0   ;;  %vm1228_vm1 = vmmov (!%p245_p3), 0  }
   0x8   : > { %1105 = vmatprep.subr.mxu1 (!%p245_p3), %v1227_v8  ;;  %1120 = vmatprep.subr.mxu0 (!%p245_p3), %v1227_v8  ;;  %v335_v9 = vlaneseq (!%p245_p3)  ;;  %vm419_vm3 = vcmask (!%p245_p3), 64512   ;;  %vm873_vm4 = vcmask (!%p245_p3), 1040384   ;;  %vm931_vm14 = vcmask (!%p245_p3), 1043456  }
   0x9   : > { %1122 = vmatprep.mubr.msk.f32.mxu0 (!%p245_p3), %vm1228_vm1, %v1227_v8  ;;  %1107 = vmatprep.mubr.msk.f32.mxu1 (!%p245_p3), %vm1228_vm1, %v1227_v8 }
   0xa   : > { %v1295_v10 = vshrl.u32 (!%p245_p3), %v335_v9, 7 }
   0xc   : > { %v358_v11 = vsub.s32 (!%p245_p3), 3, %v1295_v10  ;;  %v337_v12 = vsub.s32 (!%p245_p3), 2, %v1295_v10  ;;  %v367_v13 = vsub.s32 (!%p245_p3), 1, %v1295_v10  ;;  %v347_v14 = vsub.s32 (!%p245_p3), 0, %v1295_v10 }
   0xd   : > { %v379_v22 = vsub.s32 (!%p245_p3), 4, %v1295_v10 }
   0xe   : > { %s1394_s18 = smov (!%p292_p4, %s1211_s18), 1  ;;  %v359_v18 = vrot.slane %v332_v15, %v358_v11  ;;  %v338_v19 = vrot.slane %v332_v15, %v337_v12  ;;  %v368_v20 = vrot.slane %v332_v15, %v367_v13  ;;  %v348_v21 = vrot.slane %v332_v15, %v347_v14 }
   0xf   : > { %s1283_s22 = sshll.u32 %s1394_s18, 3  ;;  %v380_v29 = vrot.slane %v332_v15, %v379_v22  ;;  %s1080_s6 = sshll.u32 %s1394_s18, 2 }
  0x10   : > { %s313_s25 = scalar_lea.vmem %s1386_s3, %s1283_s22  ;;  %s317_s30 = scalar_lea.vmem %s1387_s4, %s1283_s22 }
  0x11   : > { %v333_v2 = vld [vmem:[%s313_s25] sm:$0xff]  ;;  %s1345_s9 = scalar_lea.vmem %s1388_s5, %s1080_s6  ;;  %s298_s13 = scalar_lea.vmem %s1383_s0, %s1283_s22 }
  0x12   : > { %361 = vperm.xlu1 %1189, %v333_v2   ;;  %341 = vperm.xlu0 %1187, %v333_v2   ;;  %vm390_vm0 = vcmp.gt.f32.partialorder %v333_v2, 0.0  ;;  %v334_v45 = vld [vmem:[%s317_s30] sm:$0xff]  ;;  %326 = vst [vmem:[%s1345_s9] sm:$0x7] %v1227_v8  ;;  %s305_s18 = scalar_lea.vmem %s1384_s1, %s1080_s6 }
  0x13   : > { %v391_v5 = vsel %vm390_vm0, 1, %v1224_v4  ;;  %v421_v47 = vsel %vm419_vm3, %v334_v45, 0 }
  0x14   : > { %v489_v50 = vand.u32 4294901760, %v421_v47 }
  0x16   : > { %1190 = vset.pattern.permute.xlu1 %v1223_v3  ;;  %1188 = vset.pattern.permute.xlu0 %v1224_v4  ;;  %v490_v52 = vsub.f32 %v421_v47, %v489_v50 }
  0x17   : > { %370 = vperm.xlu1 %1190, %v333_v2   ;;  %350 = vperm.xlu0 %1188, %v333_v2  }
  0x18   : > { %v491_v57 = vand.u32 4294901760, %v490_v52 }
  0x1a   : > { %v492_v60 = vsub.f32 %v490_v52, %v491_v57 }
  0x1b   : > { %1191 = vset.pattern.permute.xlu1 %v1225_v6  ;;  %1192 = vset.pattern.permute.xlu0 %v1226_v7 }
  0x1c   : > { %382 = vperm.xlu1 %1191, %v333_v2   ;;  %393 = vperm.xlu0 %1192, %v391_v5   ;;  %v493_v63 = vand.u32 4294901760, %v492_v60  ;;  %v1229_v2 = vmov 1.0  }
  0x91   : > { %v362_v16 = vpop.permute.xlu1 %361  ;;  %v342_v17 = vpop.permute.xlu0 %341 }
  0x92   : > { %v364_v25 = vmin.f32 %v359_v18, %v362_v16  ;;  %v344_v26 = vmin.f32 %v338_v19, %v342_v17  ;;  %v950_v16 = vld [vmem:[%s1345_s9 + $0x2] sm:$0x1] }
  0x93   : > { %v331_v19 = vld [vmem:[%s1385_s2] sm:$0xff] }
  0x96   : > { %v371_v23 = vpop.permute.xlu1 %370  ;;  %v351_v24 = vpop.permute.xlu0 %350 }
  0x97   : > { %v373_v27 = vmax.f32 %v368_v20, %v371_v23  ;;  %v353_v28 = vmax.f32 %v348_v21, %v351_v24  ;;  %v327_v24 = vld [vmem:[%s298_s13] sm:$0xff] }
  0x99   : > { %v374_v30 = vsub.f32 %v364_v25, %v373_v27  ;;  %v354_v31 = vsub.f32 %v344_v26, %v353_v28  ;;  %v920_v26 = vrot.slane %v331_v19, 4 }
  0x9b   : > { %v375_v32 = vmax.f32 %v374_v30, 0.0  ;;  %v355_v33 = vmax.f32 %v354_v31, 0.0  ;;  %v383_v34 = vpop.permute.xlu1 %382  ;;  %v394_v39 = vpop.permute.xlu0 %393  ;;  %v328_v30 = vmax.f32 %v327_v24, 0.0001  ;;  %v330_v31 = vld [vmem:[%s305_s18] sm:$0xf] }
  0x9c   : > { %v385_v35 = vadd.f32 %v383_v34, %v380_v29  ;;  %vm395_vm2 = vcmp.eq.s32.totalorder %v394_v39, 1 }
  0x9d   : > { %v376_v36 = vmul.f32 %v375_v32, %v355_v33 }
  0x9f   : > { %v386_v37 = vsub.f32 %v385_v35, %v376_v36 }
  0xa1   : > { %v387_v38 = vmax.f32 %v386_v37, 1e-08 }
  0xa3   : > { %1193 = vrcp.f32 %v387_v38 }
  0xad   : > { %v1194_v40 = vpop.eup %1193 }
  0xae   : > { %v389_v41 = vmul.f32 %v1194_v40, %v376_v36  ;;  %v329_v36 = vmin.f32 %v328_v30, 0.9999 }
  0xb0   : > { %v396_v42 = vsel %vm395_vm2, %v389_v41, -1.0  ;;  %v898_v40 = vsub.f32 1.0, %v329_v36 }
  0xb1   : > { %v397_v43 = vrot.slane %v396_v42, 4 }
  0xb3   : > { %v398_v44 = vmax.f32 %v396_v42, %v397_v43 }
  0xb5   : > { %v399_v46 = vrot.slane %v398_v44, 2 }
  0xb7   : > { %v400_v48 = vmax.f32 %v398_v44, %v399_v46 }
  0xb9   : > { %v401_v49 = vrot.slane %v400_v48, 1 }
  0xbb   : > { %v1311_v51 = vmax.f32 %v400_v48, %v401_v49 }
  0xbd   : > { %vm405_vm5 = vcmp.eq.f32.partialorder %v396_v42, %v1311_v51  ;;  %vm869_vm6 = vcmp.ge.f32.partialorder %v1311_v51, 0.5  ;;  %vm870_vm11 = vcmp.lt.f32.partialorder %v1311_v51, 0.4  ;;  %v1230_v42 = vmov -1.0  }
  0xbe   : > { %v406_v53 = vsel %vm405_vm5, %v1295_v10, 8  ;;  %v1088_v54 = vsel %vm869_vm6, 1.0, %v1227_v8  ;;  %v893_v43 = vsel %vm870_vm11, 0.0, %v1230_v42 }
  0xbf   : > { %v407_v55 = vrot.slane %v406_v53, 4  ;;  %v874_v56 = vsel %vm873_vm4, %v1088_v54, 0.0 }
  0xc0   : > { %875 = vadd.xlane.f32.xlu1 %v874_v56 }
  0xc1   : > { %vm408_vm7 = vcmp.lt.s32.totalorder %v406_v53, %v407_v55 }
  0xc2   : > { %v409_v58 = vsel %vm408_vm7, %v406_v53, %v407_v55  ;;  %v1231_v53 = vmov 0.75  }
  0xc3   : > { %v410_v59 = vrot.slane %v409_v58, 2 }
  0xc5   : > { %vm411_vm8 = vcmp.lt.s32.totalorder %v409_v58, %v410_v59 }
  0xc6   : > { %v412_v61 = vsel %vm411_vm8, %v409_v58, %v410_v59 }
  0xc7   : > { %v413_v62 = vrot.slane %v412_v61, 1 }
  0xc9   : > { %vm414_vm9 = vcmp.lt.s32.totalorder %v412_v61, %v413_v62 }
  0xca   : > { %v415_v0 = vsel %vm414_vm9, %v412_v61, %v413_v62 }
  0xcb   : > { %vm416_vm10 = vcmp.eq.s32.totalorder %v1295_v10, %v415_v0 }
  0xcc   : > { %v1084_v1 = vsel %vm416_vm10, 1.0, %v1227_v8  ;;  %1106 = vmatpush3.msk.msra.mxu1 %vm416_vm10, %v1229_v2  ;;  %1121 = vmatpush3.msk.msra.mxu0 %vm416_vm10, %v1229_v2 }
  0xcd   : > { %v501_v3 = vsub.f32 %v1084_v1, %v1084_v1  ;;  %1123 = vmatmul.mubr.f32.vlgmr.msra.gmra.mrb[0].mxu0 %v491_v57  ;;  %1108 = vmatmul.mubr.f32.vlgmr.msra.gmra.mrb[0].mxu1 %v493_v63 }
  0xce   : > { %1125 = vmatprep.subr.mxu0 %v1227_v8  ;;  %1110 = vmatprep.subr.mxu1 %v1227_v8 }
  0xcf   : > { %v502_v4 = vand.u32 4294901760, %v501_v3  ;;  %1127 = vmatprep.mubr.msk.f32.mxu0 %vm1228_vm1, %v1227_v8  ;;  %1112 = vmatprep.mubr.msk.f32.mxu1 %vm1228_vm1, %v1227_v8 }
  0xd1   : > { %1126 = vmatpush3.msra.mxu0 %v502_v4  ;;  %v503_v5 = vsub.f32 %v501_v3, %v502_v4 }
  0xd2   : > { %1130 = vmatprep.subr.mxu0 %v1227_v8 }
  0xd3   : > { %v504_v6 = vand.u32 4294901760, %v503_v5 }
  0xd5   : > { %1111 = vmatpush3.msra.mxu1 %v504_v6  ;;  %1128 = vmatmul.mubr.f32.vlgmr.msra.gmra.mrb[0].mxu0 %v489_v50 }
  0xd6   : > { %1131 = vmatpush3.msk.msra.mxu0 %vm416_vm10, %v1229_v2  ;;  %1113 = vmatmul.mubr.f32.vlgmr.msra.gmra.mrb[0].mxu1 %v489_v50 }
  0xd7   : > { %1115 = vmatprep.subr.mxu1 %v1227_v8  ;;  %1132 = vmatprep.mubr.msk.f32.mxu0 %vm1228_vm1, %v1227_v8 }
  0xd8   : > { %1116 = vmatpush3.msra.mxu1 %v501_v3  ;;  %1117 = vmatprep.mubr.msk.f32.mxu1 %vm1228_vm1, %v1227_v8 }
  0xdd   : > { %1133 = vmatmul.mubr.f32.vlgmr.msra.gmra.mrb[0].mxu0 %v489_v50 }
  0xde   : > { %1118 = vmatmul.mubr.f32.vlgmr.msra.gmra.mrb[0].mxu1 %v490_v52 }
 0x14d   : > { %v876_v7 = vpop.xlane.xlu1 %875 }
 0x14e   : > { %v877_v9 = vrot.slane %v876_v7, 4 }
 0x150   : > { %v878_v11 = vadd.f32 %v877_v9, %v876_v7  ;;  %v942_v9 = vld [vmem:[%s1345_s9] sm:$0x1] }
 0x152   : > { %v879_v12 = vrot.slane %v878_v11, 2 }
 0x154   : > { %v880_v13 = vadd.f32 %v879_v12, %v878_v11  ;;  %v946_v11 = vld [vmem:[%s1345_s9 + $0x1] sm:$0x1] }
 0x156   : > { %v881_v14 = vrot.slane %v880_v13, 1 }
 0x158   : > { %v882_v15 = vadd.f32 %v881_v14, %v880_v13 }
 0x15a   : > { %1144 = vpush %v882_v15 }
 0x18b   : > { %s1145_s10 = spop %1144 }
 0x18c   : > { %v951_v17 = vstv %s1145_s10 }
 0x18d   : > { %v952_v18 = vadd.f32 %v951_v17, %v950_v16 }
 0x18f   : > { %953 = vst [vmem:[%s1345_s9 + $0x2] sm:$0x1] %v952_v18 }
 0x1b0   : > { %v865_v20 = vpop.f32.mrb[0].mxu0 }
 0x1b1   : > { %v645_v21 = vpop.f32.mrb[0].mxu1  ;;  %v1134_v23 = vpop.f32.mrb[1].mxu0 }
 0x1b2   : > { %v1135_v25 = vadd.f32 %v865_v20, %v645_v21  ;;  %v1119_v27 = vpop.f32.mrb[1].mxu1 }
 0x1b4   : > { %v884_v28 = vadd.f32 0.5, %v1135_v25  ;;  %v918_v29 = vsub.f32 %v1135_v25, %v331_v19 }
 0x1b6   : > { %v1146_v32 = vtrunc.f32 %v884_v28  ;;  %v922_v33 = vmul.f32 %v920_v26, %v918_v29 }
 0x1b8   : > { %v1147_v34 = vcvt.f32.s32 %v1146_v32  ;;  %v923_v35 = vsub.f32 %v922_v33, %v330_v31 }
 0x1ba   : > { %v889_v37 = vrot.slane %v1147_v34, %v379_v22  ;;  %v924_v38 = vand.u32 2147483647, %v923_v35 }
 0x1bc   : > { %v926_v39 = vmul.f32 4.5, %v924_v38  ;;  %vm890_vm12 = vcmp.eq.s32.totalorder %v1295_v10, %v889_v37  ;;  %v1090_v45 = vadd.f32 -0.055555556, %v924_v38  ;;  %vm925_vm13 = vcmp.le.f32.partialorder %v924_v38, 0.11111111 }
 0x1bd   : > { %v1089_v41 = vsel %vm890_vm12, 1.0, %v1227_v8 }
 0x1be   : > { %v927_v44 = vmul.f32 %v926_v39, %v924_v38  ;;  %v895_v46 = vsel %vm869_vm6, %v1089_v41, %v893_v43 }
 0x1bf   : > { %vm896_vm15 = vcmp.eq.f32.partialorder %v895_v46, 1.0  ;;  %vm906_vm0 = vcmp.ne.f32.partialorder %v895_v46, -1.0 }
 0x1c0   : > { %v929_v22 = vsel %vm925_vm13, %v927_v44, %v1090_v45  ;;  %v902_v47 = vsel %vm896_vm15, %v329_v36, %v898_v40  ;;  %v899_v49 = vsel %vm896_vm15, %v898_v40, %v329_v36  ;;  %v897_v54 = vsel %vm896_vm15, 0.25, %v1231_v53 }
 0x1c1   : > { %v930_v48 = vsel %vm869_vm6, %v929_v22, 0.0  ;;  %1195 = vlog2.f32 %v902_v47  ;;  %v900_v8 = vmul.f32 %v899_v49, %v899_v49 }
 0x1c2   : > { %v932_v10 = vsel %vm931_vm14, %v930_v48, 0.0 }
 0x1c3   : > { %933 = vadd.xlane.f32.xlu1 %v932_v10  ;;  %v901_v55 = vmul.f32 %v900_v8, %v897_v54 }
 0x1cb   : > { %v1196_v50 = vpop.eup %1195 }
 0x1cc   : > { %v904_v52 = vmul.f32 0.6931472, %v1196_v50 }
 0x1ce   : > { %v905_v56 = vsub.f32 0.0, %v904_v52 }
 0x1d0   : > { %v907_v57 = vmul.f32 %v905_v56, %v901_v55 }
 0x1d2   : > { %v908_v58 = vsel %vm906_vm0, %v907_v57, 0.0 }
 0x1d3   : > { %909 = vadd.xlane.f32.xlu0 %v908_v58 }
 0x250   : > { %v934_v59 = vpop.xlane.xlu1 %933 }
 0x251   : > { %v935_v60 = vrot.slane %v934_v59, 4 }
 0x253   : > { %v936_v51 = vadd.f32 %v935_v60, %v934_v59 }
 0x255   : > { %v937_v61 = vrot.slane %v936_v51, 2 }
 0x257   : > { %v938_v1 = vadd.f32 %v937_v61, %v936_v51 }
 0x259   : > { %v939_v4 = vrot.slane %v938_v1, 1 }
 0x25b   : > { %v940_v7 = vadd.f32 %v939_v4, %v938_v1 }
 0x260   : > { %v910_v62 = vpop.xlane.xlu0 %909 }
 0x261   : > { %v911_v63 = vrot.slane %v910_v62, 4 }
 0x263   : > { %v912_v0 = vadd.f32 %v911_v63, %v910_v62 }
 0x265   : > { %v913_v2 = vrot.slane %v912_v0, 2 }
 0x267   : > { %v914_v3 = vadd.f32 %v913_v2, %v912_v0 }
 0x269   : > { %v915_v5 = vrot.slane %v914_v3, 1 }
 0x26b   : > { %v916_v6 = vadd.f32 %v915_v5, %v914_v3 }
 0x26d   : > { %1148 = vpush %v916_v6 }
 0x26e   : > { %1150 = vpush %v940_v7 }
 0x29e   : > { %s1149_s22 = spop %1148 }
 0x29f   : > { %v943_v12 = vstv %s1149_s22  ;;  %s1151_s23 = spop %1150 }
 0x2a0   : > { %v944_v13 = vadd.f32 %v943_v12, %v942_v9  ;;  %v947_v14 = vstv %s1151_s23 }
 0x2a1   : > { %v948_v15 = vadd.f32 %v947_v14, %v946_v11 }
 0x2a2   : > { %945 = vst [vmem:[%s1345_s9] sm:$0x1] %v944_v13 }
 0x2a3   : > { %949 = vst [vmem:[%s1345_s9 + $0x1] sm:$0x1] %v948_v15 }
 0x2a4 PF: > { %s15_s20 = sadd.s32 1, %s1219_s20   ;;  %s1389_s18 = smov %s1215_s19 }
 0x2a5   : > { %p12_p5 = scmp.ge.s32.totalorder %s15_s20, 4   ;;  %s1390_s19 = smov %s1392_s21 }
 0x2a7   :  { %14 = sbr.rel (!%p12_p5) target bundleno = 2 (0x2), region = 86 }

</bundles_post_ra>
